<compile_context>
chip_gen: v5e
topology: v5e:2x2
jax: 0.10.0
libtpu: 0.0.40
codegen_flags: <defaults>
</compile_context>

<pallas_src>
import math

import jax
import jax.numpy as jnp
from jax.experimental import pallas as pl
from jax.experimental.pallas import tpu as pltpu

# Small shapes consistent with the module (768 -> 128, 1024 -> 256, 1536 -> 256,
# 384 -> 64, 2 -> 2).  13 graph nodes exactly as in the module.
B, S, H = 2, 16, 128        # batch, seq len, hidden
H1 = 256                    # gc1 output width
N = 13                      # graph nodes per example
NC = 3                      # CLS-derived nodes (clsout, e_out, et_out)
NP = N - NC                 # mask-pooled nodes (begin, end, left1-4, right1-4)
BN = B * N                  # stacked node count across the batch
NS = B * S + B * NC         # stacked feature rows (token rows + cls rows) = 38
F1, F2, F3 = H, H // 2, 2   # MLP head widths

# ---- slab layouts (row offsets are multiples of 16 -> bf16/f32 tile aligned) ----
# per-call activation slab (bf16, 128 lanes)
ACT_STACK = 0               # rows [0:128)   : stack, real (NS, H)
ACT_ASEL = 128              # rows [128:256) : asel = adj_g @ sel, real (BN, NS)
ACT_CLSO = 256              # rows [256:264) : clso, real (B, H)
ACT_ROWS = 272
# constant weight slab (bf16, 256 lanes)
WB_W1 = 0                   # rows [0:128)   : W1 (H, H1)
WB_W2P = 128                # rows [128:384) : w2p = W2 @ wl1[H:2H] (H1, F1) in lanes [0:128)
WB_WL1T = 384               # rows [384:512) : wl1[:H] (H, F1) in lanes [0:128)
WB_RG = 512                 # rows [512:520) : colsum(adj) rows, real (B, BN)
WB_ROWS = 528
# constant MLP-tail slab (f32, 128 lanes)
WF_WL2 = 0                  # rows [0:128)   : wl2, real (F1, F2)
WF_WL3 = 128                # rows [128:256) : wl3, real (F2, F3)
WF_BL1 = 256                # bias rows
WF_BL2 = 257
WF_BL3 = 258
WF_ROWS = 264
OUT_ROWS = 8                # lane-dense (8,128) output tile; wrapper slices [:B, :F3]


def gcnbert_kernel(act_ref, wb_ref, wf_ref, out_ref):
    f32, bf16 = jnp.float32, jnp.bfloat16

    # per-call activation slab (bf16)
    stack = act_ref[ACT_STACK:ACT_STACK + 128, :]        # (128,128), real (NS, H)
    asel = act_ref[ACT_ASEL:ACT_ASEL + 128, :]           # (128,128), real (BN, NS)
    clso = act_ref[ACT_CLSO:ACT_CLSO + OUT_ROWS, :]      # (8,128),   real (B, H)

    # constant bf16 weight slab
    w1 = wb_ref[WB_W1:WB_W1 + H, :]                      # (128,256)
    w2p = wb_ref[WB_W2P:WB_W2P + H1, 0:F1]               # (256,128) = W2 @ wl1[H:2H]
    wl1t = wb_ref[WB_WL1T:WB_WL1T + H, 0:F1]             # (128,128) = wl1[:H]
    rg = wb_ref[WB_RG:WB_RG + OUT_ROWS, 0:128]           # (8,128),  real (B, BN)

    # constant f32 tail slab
    wl2 = wf_ref[WF_WL2:WF_WL2 + F1, :]                  # (128,128), real (F1, F2)
    wl3 = wf_ref[WF_WL3:WF_WL3 + 128, :]                 # (128,128), real (F2, F3)
    bl1 = wf_ref[WF_BL1:WF_BL1 + 1, :]                   # (1,128)
    bl2 = wf_ref[WF_BL2:WF_BL2 + 1, :]                   # (1,128)
    bl3 = wf_ref[WF_BL3:WF_BL3 + 1, :]                   # (1,128)

    # adj @ nip folded via asel = adj_g @ sel (wrapper):  an = (adj @ nip) = asel @ stack
    an = jnp.dot(asel, stack, preferred_element_type=f32)               # (128, H)
    # gc1 (reordered): x1 = LeakyReLU((adj @ nip) @ W1)
    s1 = jnp.dot(an.astype(bf16), w1, preferred_element_type=f32)       # (128, H1)
    x1 = jnp.where(s1 > 0, s1, 0.2 * s1)                                # LeakyReLU(0.2)

    # gc2 + node-sum + first-linear fold (all exact reassociations):
    #   node_sum @ wl1[H:2H] == ((colsum(adj) @ x1) @ W2) @ wl1[H:2H] == (rg @ x1) @ w2p
    v = jnp.dot(rg, x1.astype(bf16), preferred_element_type=f32)        # (8, H1)
    g = jnp.dot(v.astype(bf16), w2p, preferred_element_type=f32)        # (8, F1)
    c = jnp.dot(clso, wl1t, preferred_element_type=f32)                 # (8, F1)

    # MLP head tail (kept f32) + sigmoid; output lane-dense (8,128)
    h = jnp.maximum(g + c + bl1, 0.0)
    h = jnp.maximum(jnp.dot(h, wl2, preferred_element_type=f32) + bl2, 0.0)
    logits = jnp.dot(h, wl3, preferred_element_type=f32) + bl3
    out_ref[...] = jax.nn.sigmoid(logits)


# ------------------------- init-time packing (hoisted, runs once) -------------------------

def pack_graph_constants(adj):
    """Batch-major block-diagonal normalized adjacency and its column-sum rows."""
    adj_g = jnp.kron(jnp.eye(B, dtype=jnp.float32), adj)                          # (BN, BN)
    r_g = jnp.kron(jnp.eye(B, dtype=jnp.float32), jnp.sum(adj, axis=0)[None, :])  # (B, BN)
    return adj_g, r_g


def pack_weight_slabs(adj, w1, w2, wl1, bl1, wl2, bl2, wl3, bl3):
    hp = jax.lax.Precision.HIGHEST
    _, r_g = pack_graph_constants(adj)
    w2p = jnp.dot(w2, wl1[H:2 * H, :], precision=hp)                    # (H1, F1) pre-fold

    wb = jnp.zeros((WB_ROWS, 256), jnp.float32)
    wb = wb.at[WB_W1:WB_W1 + H, :].set(w1)
    wb = wb.at[WB_W2P:WB_W2P + H1, 0:F1].set(w2p)
    wb = wb.at[WB_WL1T:WB_WL1T + H, 0:F1].set(wl1[:H, :])
    wb = wb.at[WB_RG:WB_RG + B, 0:BN].set(r_g)
    wb = wb.astype(jnp.bfloat16)

    wf = jnp.zeros((WF_ROWS, 128), jnp.float32)
    wf = wf.at[WF_WL2:WF_WL2 + F1, 0:F2].set(wl2)
    wf = wf.at[WF_WL3:WF_WL3 + F2, 0:F3].set(wl3)
    wf = wf.at[WF_BL1, 0:F1].set(bl1.reshape(-1))
    wf = wf.at[WF_BL2, 0:F2].set(bl2.reshape(-1))
    wf = wf.at[WF_BL3, 0:F3].set(bl3.reshape(-1))
    return wb, wf


# ------------------------- per-call wrapper (layout plumbing only) -------------------------

def pack_activations(bert_out, masks, cls3, clso, adj_g):
    """Single bf16 activation slab: stack | asel = adj_g @ sel | clso (zero-padded)."""
    hp = jax.lax.Precision.HIGHEST
    # selection/pooling matrix in batch-major node order: row b*N+j picks
    #   j <  NC : cls row b*NC + j     |     j >= NC : masks[b, j-NC, :] over example b tokens
    sel = jnp.zeros((B, N, NS), jnp.float32)
    for b in range(B):
        sel = sel.at[b, NC:N, b * S:(b + 1) * S].set(masks[b].astype(jnp.float32))
        sel = sel.at[b, 0:NC, B * S + b * NC:B * S + (b + 1) * NC].set(
            jnp.eye(NC, dtype=jnp.float32))
    sel = sel.reshape(BN, NS)
    asel = jnp.dot(adj_g, sel, precision=hp)                            # (BN, NS) tiny fold

    stack = jnp.concatenate(
        [bert_out.astype(jnp.float32).reshape(B * S, H),
         cls3.astype(jnp.float32).reshape(B * NC, H)], axis=0)          # (NS, H)

    act = jnp.zeros((ACT_ROWS, 128), jnp.float32)
    act = act.at[ACT_STACK:ACT_STACK + NS, :].set(stack)
    act = act.at[ACT_ASEL:ACT_ASEL + BN, 0:NS].set(asel)
    act = act.at[ACT_CLSO:ACT_CLSO + B, :].set(clso.astype(jnp.float32))
    return act.astype(jnp.bfloat16)


def gcnbert_forward(bert_out, masks, cls3, clso, adj_g, wb_slab, wf_slab):
    act = pack_activations(bert_out, masks, cls3, clso, adj_g)
    out = pl.pallas_call(
        gcnbert_kernel,
        out_shape=jax.ShapeDtypeStruct((OUT_ROWS, 128), jnp.float32),
        in_specs=[pl.BlockSpec(memory_space=pltpu.MemorySpace.VMEM)] * 3,
        out_specs=pl.BlockSpec(memory_space=pltpu.MemorySpace.VMEM),
    )(act, wb_slab, wf_slab)
    return out[:B, :F3]


# ------------------------- pure-JAX reference (unfused, mirrors the module) ---------------

def gcnbert_reference(bert_out, masks, cls3, clso, adj,
                      w1, w2, wl1, bl1, wl2, bl2, wl3, bl3):
    hp = jax.lax.Precision.HIGHEST
    pooled = jnp.einsum('bms,bsh->bmh', masks, bert_out, precision=hp)     # (B, 10, H)
    nip = jnp.concatenate([cls3, pooled], axis=1)                          # (B, 13, H)
    x = jnp.einsum('nm,bmk->bnk', adj,
                   jnp.einsum('bmh,hk->bmk', nip, w1, precision=hp), precision=hp)
    x = jnp.where(x > 0, x, 0.2 * x)
    x = jnp.einsum('nm,bmk->bnk', adj,
                   jnp.einsum('bmh,hk->bmk', x, w2, precision=hp), precision=hp)
    x = jnp.sum(x, axis=1)                                                 # (B, H)
    x = jnp.concatenate([clso, x], axis=1)                                 # (B, 2H)
    x = jnp.maximum(jnp.dot(x, wl1, precision=hp) + bl1, 0.0)
    x = jnp.maximum(jnp.dot(x, wl2, precision=hp) + bl2, 0.0)
    x = jnp.dot(x, wl3, precision=hp) + bl3
    return jax.nn.sigmoid(x)


# ------------------------- plain-JAX glue (param setup) -------------------------

def gen_A_synthetic(key, num_classes=N, t=0.3):
    # deterministic stand-in for gen_A(13, t, adj_file) (no file access)
    raw = jax.random.uniform(key, (num_classes, num_classes), jnp.float32)
    a = (raw >= t).astype(jnp.float32)
    a = a * 0.25 / (a.sum(axis=0, keepdims=True) + 1e-6)
    a = a + jnp.eye(num_classes, dtype=jnp.float32)
    return a


def gen_adj(A):
    # adj = (A D^{-1/2})^T D^{-1/2}  (ML-GCN normalization)
    D = jnp.power(A.sum(axis=1), -0.5)
    D = jnp.diag(D)
    return jnp.matmul(jnp.matmul(A, D).T, D)


def uniform_init(key, shape, bound):
    return jax.random.uniform(key, shape, jnp.float32, -bound, bound)


if __name__ == "__main__":
    key = jax.random.PRNGKey(0)
    ks = jax.random.split(key, 20)

    # GraphConvolution weights (stdv = 1/sqrt(out_features), as in reset_parameters)
    w1 = uniform_init(ks[0], (H, H1), 1.0 / math.sqrt(H1))
    w2 = uniform_init(ks[1], (H1, H), 1.0 / math.sqrt(H))

    # MLP head (torch Linear default init, weights stored (in, out))
    wl1 = uniform_init(ks[2], (2 * H, F1), 1.0 / math.sqrt(2 * H))
    bl1 = uniform_init(ks[3], (1, F1), 1.0 / math.sqrt(2 * H))
    wl2 = uniform_init(ks[4], (F1, F2), 1.0 / math.sqrt(F1))
    bl2 = uniform_init(ks[5], (1, F2), 1.0 / math.sqrt(F1))
    wl3 = uniform_init(ks[6], (F2, F3), 1.0 / math.sqrt(F2))
    bl3 = uniform_init(ks[7], (1, F3), 1.0 / math.sqrt(F2))

    # normalized adjacency (detached constant in the original forward)
    A = gen_A_synthetic(ks[8])
    adj = gen_adj(A)

    # synthetic BERT outputs / inputs (see TODO(synk) above)
    bert_out = jax.random.normal(ks[9], (B, S, H), jnp.float32)
    clso = jax.random.normal(ks[10], (B, H), jnp.float32)
    clsout = jax.random.normal(ks[11], (B, H), jnp.float32)
    e_out = jax.random.normal(ks[12], (B, H), jnp.float32)
    et_out = jax.random.normal(ks[13], (B, H), jnp.float32)
    cls3 = jnp.stack([clsout, e_out, et_out], axis=1)            # (B, 3, H)

    # 10 binary token-indicator masks: begin, end, left1-4, right1-4
    masks = (jax.random.uniform(ks[14], (B, NP, S)) < 0.3).astype(jnp.float32)

    # Constant packing hoisted out of the per-call path (opt #7): once at init.
    adj_g, _ = pack_graph_constants(adj)
    wb_slab, wf_slab = pack_weight_slabs(adj, w1, w2, wl1, bl1, wl2, bl2, wl3, bl3)
    adj_g, wb_slab, wf_slab = jax.block_until_ready((adj_g, wb_slab, wf_slab))

    fwd = jax.jit(gcnbert_forward)
    out = fwd(bert_out, masks, cls3, clso, adj_g, wb_slab, wf_slab)
    out = jax.block_until_ready(out)
    assert out.shape == (B, F3) and out.dtype == jnp.float32

    ref = jax.block_until_ready(gcnbert_reference(
        bert_out, masks, cls3, clso, adj,
        w1, w2, wl1, bl1, wl2, bl2, wl3, bl3))
    err = float(jnp.max(jnp.abs(out - ref)))
    assert err < 2e-2, f"kernel vs reference max abs error {err}"

    print("KERNEL_OK")
</pallas_src>

<mosaic_0001>
module attributes {stable_mosaic.version = 11 : i64} {
  func.func @gcnbert_kernel(%arg0: memref<272x128xbf16, #tpu.memory_space<vmem>>, %arg1: memref<528x256xbf16, #tpu.memory_space<vmem>>, %arg2: memref<264x128xf32, #tpu.memory_space<vmem>>, %arg3: memref<8x128xf32, #tpu.memory_space<vmem>>) attributes {dimension_semantics = [], scalar_prefetch = 0 : i64, scratch_operands = 0 : i64, tpu.core_type = #tpu.core_type<tc>} {
    %c0 = arith.constant 0 : index
    %c0_0 = arith.constant 0 : index
    %0 = vector.load %arg0[%c0, %c0_0] : memref<272x128xbf16, #tpu.memory_space<vmem>>, vector<128x128xbf16>
    %c128 = arith.constant 128 : index
    %c0_1 = arith.constant 0 : index
    %1 = vector.load %arg0[%c128, %c0_1] : memref<272x128xbf16, #tpu.memory_space<vmem>>, vector<128x128xbf16>
    %c256 = arith.constant 256 : index
    %c0_2 = arith.constant 0 : index
    %2 = vector.load %arg0[%c256, %c0_2] : memref<272x128xbf16, #tpu.memory_space<vmem>>, vector<8x128xbf16>
    %c0_3 = arith.constant 0 : index
    %c0_4 = arith.constant 0 : index
    %3 = vector.load %arg1[%c0_3, %c0_4] : memref<528x256xbf16, #tpu.memory_space<vmem>>, vector<128x256xbf16>
    %c128_5 = arith.constant 128 : index
    %c0_6 = arith.constant 0 : index
    %4 = vector.load %arg1[%c128_5, %c0_6] : memref<528x256xbf16, #tpu.memory_space<vmem>>, vector<256x128xbf16>
    %c384 = arith.constant 384 : index
    %c0_7 = arith.constant 0 : index
    %5 = vector.load %arg1[%c384, %c0_7] : memref<528x256xbf16, #tpu.memory_space<vmem>>, vector<128x128xbf16>
    %c512 = arith.constant 512 : index
    %c0_8 = arith.constant 0 : index
    %6 = vector.load %arg1[%c512, %c0_8] : memref<528x256xbf16, #tpu.memory_space<vmem>>, vector<8x128xbf16>
    %c0_9 = arith.constant 0 : index
    %c0_10 = arith.constant 0 : index
    %7 = vector.load %arg2[%c0_9, %c0_10] : memref<264x128xf32, #tpu.memory_space<vmem>>, vector<128x128xf32>
    %c128_11 = arith.constant 128 : index
    %c0_12 = arith.constant 0 : index
    %8 = vector.load %arg2[%c128_11, %c0_12] : memref<264x128xf32, #tpu.memory_space<vmem>>, vector<128x128xf32>
    %c256_13 = arith.constant 256 : index
    %c0_14 = arith.constant 0 : index
    %9 = vector.load %arg2[%c256_13, %c0_14] : memref<264x128xf32, #tpu.memory_space<vmem>>, vector<1x128xf32>
    %c257 = arith.constant 257 : index
    %c0_15 = arith.constant 0 : index
    %10 = vector.load %arg2[%c257, %c0_15] : memref<264x128xf32, #tpu.memory_space<vmem>>, vector<1x128xf32>
    %c258 = arith.constant 258 : index
    %c0_16 = arith.constant 0 : index
    %11 = vector.load %arg2[%c258, %c0_16] : memref<264x128xf32, #tpu.memory_space<vmem>>, vector<1x128xf32>
    %cst = arith.constant dense<0.000000e+00> : vector<128x128xf32>
    %12 = tpu.matmul %1, %0, %cst {dimension_numbers = #tpu.dot_dimension_numbers<[1], [0], [0], [1], [0, 0, 1, 1], [], []>} : vector<128x128xbf16>, vector<128x128xbf16>, vector<128x128xf32> -> vector<128x128xf32>
    %13 = arith.truncf %12 : vector<128x128xf32> to vector<128x128xbf16>
    %cst_17 = arith.constant dense<0.000000e+00> : vector<128x256xf32>
    %14 = tpu.matmul %13, %3, %cst_17 {dimension_numbers = #tpu.dot_dimension_numbers<[1], [0], [0], [1], [0, 0, 1, 1], [], []>} : vector<128x128xbf16>, vector<128x256xbf16>, vector<128x256xf32> -> vector<128x256xf32>
    %cst_18 = arith.constant 0.000000e+00 : f32
    %15 = vector.broadcast %cst_18 : f32 to vector<128x256xf32>
    %16 = arith.cmpf ogt, %14, %15 : vector<128x256xf32>
    %cst_19 = arith.constant 2.000000e-01 : f32
    %17 = vector.broadcast %cst_19 : f32 to vector<128x256xf32>
    %18 = arith.mulf %17, %14 : vector<128x256xf32>
    %19 = arith.select %16, %14, %18 : vector<128x256xi1>, vector<128x256xf32>
    %20 = arith.truncf %19 : vector<128x256xf32> to vector<128x256xbf16>
    %cst_20 = arith.constant dense<0.000000e+00> : vector<8x256xf32>
    %21 = tpu.matmul %6, %20, %cst_20 {dimension_numbers = #tpu.dot_dimension_numbers<[1], [0], [0], [1], [0, 0, 1, 1], [], []>} : vector<8x128xbf16>, vector<128x256xbf16>, vector<8x256xf32> -> vector<8x256xf32>
    %22 = arith.truncf %21 : vector<8x256xf32> to vector<8x256xbf16>
    %cst_21 = arith.constant dense<0.000000e+00> : vector<8x128xf32>
    %23 = tpu.matmul %22, %4, %cst_21 {dimension_numbers = #tpu.dot_dimension_numbers<[1], [0], [0], [1], [0, 0, 1, 1], [], []>} : vector<8x256xbf16>, vector<256x128xbf16>, vector<8x128xf32> -> vector<8x128xf32>
    %cst_22 = arith.constant dense<0.000000e+00> : vector<8x128xf32>
    %24 = tpu.matmul %2, %5, %cst_22 {dimension_numbers = #tpu.dot_dimension_numbers<[1], [0], [0], [1], [0, 0, 1, 1], [], []>} : vector<8x128xbf16>, vector<128x128xbf16>, vector<8x128xf32> -> vector<8x128xf32>
    %25 = arith.addf %23, %24 : vector<8x128xf32>
    %26 = vector.broadcast %9 : vector<1x128xf32> to vector<8x128xf32>
    %27 = arith.addf %25, %26 : vector<8x128xf32>
    %cst_23 = arith.constant 0.000000e+00 : f32
    %28 = vector.broadcast %cst_23 : f32 to vector<8x128xf32>
    %29 = arith.maximumf %27, %28 : vector<8x128xf32>
    %cst_24 = arith.constant dense<0.000000e+00> : vector<8x128xf32>
    %30 = tpu.matmul %29, %7, %cst_24 {dimension_numbers = #tpu.dot_dimension_numbers<[1], [0], [0], [1], [0, 0, 1, 1], [], []>} : vector<8x128xf32>, vector<128x128xf32>, vector<8x128xf32> -> vector<8x128xf32>
    %31 = vector.broadcast %10 : vector<1x128xf32> to vector<8x128xf32>
    %32 = arith.addf %30, %31 : vector<8x128xf32>
    %cst_25 = arith.constant 0.000000e+00 : f32
    %33 = vector.broadcast %cst_25 : f32 to vector<8x128xf32>
    %34 = arith.maximumf %32, %33 : vector<8x128xf32>
    %cst_26 = arith.constant dense<0.000000e+00> : vector<8x128xf32>
    %35 = tpu.matmul %34, %8, %cst_26 {dimension_numbers = #tpu.dot_dimension_numbers<[1], [0], [0], [1], [0, 0, 1, 1], [], []>} : vector<8x128xf32>, vector<128x128xf32>, vector<8x128xf32> -> vector<8x128xf32>
    %36 = vector.broadcast %11 : vector<1x128xf32> to vector<8x128xf32>
    %37 = arith.addf %35, %36 : vector<8x128xf32>
    %38 = arith.negf %37 : vector<8x128xf32>
    %39 = math.exp %38 : vector<8x128xf32>
    %cst_27 = arith.constant 1.000000e+00 : f32
    %40 = vector.broadcast %cst_27 : f32 to vector<8x128xf32>
    %41 = arith.addf %40, %39 : vector<8x128xf32>
    %42 = arith.divf %40, %41 : vector<8x128xf32>
    %c0_28 = arith.constant 0 : index
    %c0_29 = arith.constant 0 : index
    %43 = vector.load %arg3[%c0_28, %c0_29] : memref<8x128xf32, #tpu.memory_space<vmem>>, vector<8x128xf32>
    tpu.vector_store %arg3[%c0_28, %c0_29], %42 {strides = array<i32>} : memref<8x128xf32, #tpu.memory_space<vmem>>, vector<8x128xf32>,
    return
  }
}

</mosaic_0001>

<bundles_post_ra>
// kernel: gcnbert_forward.1
= control target key start
LH: loop header
LB: loop body
LE: loop exit
PB: predicated region body
PF: predicated region fallthrough
CT: control target
= control target key end

     0   :  { %8 = vsyncpa [#allocation3], 0  ;;  %s1205_s15 = smov [#allocation2]   ;;  %s1206_s17 = smov 128   ;;  %s1478_s0 = inlined_call_operand.vmem [shape: bf16[272,128], index: 0, kind: input, shape index: {}]   ;;  %s1479_s1 = inlined_call_operand.hbm [shape: bf16[528,256], index: 1, kind: input, shape index: {}]   ;;  %s1480_s2 = inlined_call_operand.vmem [shape: f32[264,128], index: 2, kind: input, shape index: {}]   ;;  %s1481_s3 = inlined_call_operand.vmem [shape: f32[8,128], index: 3, kind: output, shape index: {}]  }
   0x1   :  { %s15_s14 = sshll.u32 %s1479_s1, 4  ;;  %s17_s16 = sshll.u32 %s1205_s15, 4  ;;  %s16_s14 = int_to_ptr.hbm [resolvable:$true] %s15_s14  ;;  %s18_s16 = int_to_ptr.vmem [resolvable:$true] %s17_s16 }
   0x2   :  { %s1207_s18 = smov 8  }
   0x3   :  { %23 = dma.hbm_to_vmem [thread:$0]  %s16_s14, 8448, %s18_s16, [#allocation3], %s1206_s17, %s1206_s17, %s1207_s18  }
   0x4   :  { %1203 = dma.done.wait [#allocation3], 8448  }
   0x5   :  { %1204 = vsyncadd [#allocation3], 4294958848  ;;  %v1120_v0 = vld [vmem:[%s1478_s0 + $0x38] sm:$0xff]  ;;  %v1119_v1 = vld [vmem:[%s1478_s0 + $0x30] sm:$0xff] }
   0x6   :  { %259 = vmatpush.bf16.msra.mxu0 %v1120_v0  ;;  %v1118_v2 = vld [vmem:[%s1478_s0 + $0x28] sm:$0xff]  ;;  %v1117_v3 = vld [vmem:[%s1478_s0 + $0x20] sm:$0xff]  ;;  %v1116_v4 = vld [vmem:[%s1478_s0 + $0x18] sm:$0xff] }
   0x7   :  { %v1115_v5 = vld [vmem:[%s1478_s0 + $0x10] sm:$0xff]  ;;  %v1114_v6 = vld [vmem:[%s1478_s0 + $0x8] sm:$0xff]  ;;  %v1113_v7 = vld [vmem:[%s1478_s0] sm:$0xff] }
   0x8   :  { %v1121_v8 = vld [vmem:[%s1478_s0 + $0x40] sm:$0xff]  ;;  %v1122_v9 = vld [vmem:[%s1478_s0 + $0x48] sm:$0xff]  ;;  %v1123_v10 = vld [vmem:[%s1478_s0 + $0x50] sm:$0xff] }
   0x9   :  { %v1124_v11 = vld [vmem:[%s1478_s0 + $0x58] sm:$0xff]  ;;  %v1125_v12 = vld [vmem:[%s1478_s0 + $0x60] sm:$0xff]  ;;  %v1010_v13 = vld [vmem:[#allocation2 + $0x70] sm:$0xf] }
   0xa   :  { %260 = vmatpush.bf16.msra.mxu0 %v1119_v1  ;;  %v1144_v14 = vld [vmem:[#allocation2 + $0x74] sm:$0xf0]  ;;  %v1143_v15 = vld [vmem:[#allocation2 + $0x74] sm:$0xf]  ;;  %v1012_v17 = vld [vmem:[#allocation2 + $0x78] sm:$0xf0] }
   0xb   :  { %v1011_v16 = vor.u32 %v1144_v14, %v1010_v13  ;;  %v1002_v18 = vld [vmem:[#allocation2 + $0x60] sm:$0xf]  ;;  %v1142_v19 = vld [vmem:[#allocation2 + $0x64] sm:$0xf0]  ;;  %v1015_v20 = vor.u32 %v1143_v15, %v1012_v17  ;;  %v1141_v21 = vld [vmem:[#allocation2 + $0x64] sm:$0xf] }
   0xc   :  { %v1004_v22 = vld [vmem:[#allocation2 + $0x68] sm:$0xf0]  ;;  %v1003_v23 = vor.u32 %v1142_v19, %v1002_v18  ;;  %v994_v26 = vld [vmem:[#allocation2 + $0x50] sm:$0xf]  ;;  %v1140_v27 = vld [vmem:[#allocation2 + $0x54] sm:$0xf0] }
   0xd   :  { %396 = vmatpush.bf16.msra.mxu1 %v1011_v16  ;;  %445 = vmatpush.bf16.msra.mxu2 %v1015_v20  ;;  %v1007_v24 = vor.u32 %v1141_v21, %v1004_v22  ;;  %v1126_v25 = vld [vmem:[%s1478_s0 + $0x68] sm:$0xff]  ;;  %v1139_v28 = vld [vmem:[#allocation2 + $0x54] sm:$0xf]  ;;  %v995_v29 = vor.u32 %v1140_v27, %v994_v26  ;;  %v996_v30 = vld [vmem:[#allocation2 + $0x58] sm:$0xf0] }
   0xe   :  { %261 = vmatpush.bf16.msra.mxu0 %v1118_v2  ;;  %v999_v31 = vor.u32 %v1139_v28, %v996_v30  ;;  %v986_v32 = vld [vmem:[#allocation2 + $0x40] sm:$0xf]  ;;  %v1138_v33 = vld [vmem:[#allocation2 + $0x44] sm:$0xf0]  ;;  %v1137_v34 = vld [vmem:[#allocation2 + $0x44] sm:$0xf] }
   0xf   :  { %v987_v35 = vor.u32 %v1138_v33, %v986_v32  ;;  %v988_v36 = vld [vmem:[#allocation2 + $0x48] sm:$0xf0]  ;;  %v978_v38 = vld [vmem:[#allocation2 + $0x30] sm:$0xf]  ;;  %v1136_v39 = vld [vmem:[#allocation2 + $0x34] sm:$0xf0] }
  0x10   :  { %v991_v37 = vor.u32 %v1137_v34, %v988_v36  ;;  %v1135_v40 = vld [vmem:[#allocation2 + $0x34] sm:$0xf]  ;;  %v980_v41 = vld [vmem:[#allocation2 + $0x38] sm:$0xf0]  ;;  %v979_v42 = vor.u32 %v1136_v39, %v978_v38  ;;  %v970_v44 = vld [vmem:[#allocation2 + $0x20] sm:$0xf] }
  0x11   :  { %397 = vmatpush.bf16.msra.mxu1 %v1003_v23  ;;  %446 = vmatpush.bf16.msra.mxu2 %v1007_v24  ;;  %v983_v43 = vor.u32 %v1135_v40, %v980_v41  ;;  %v1134_v45 = vld [vmem:[#allocation2 + $0x24] sm:$0xf0]  ;;  %v1133_v46 = vld [vmem:[#allocation2 + $0x24] sm:$0xf]  ;;  %v972_v48 = vld [vmem:[#allocation2 + $0x28] sm:$0xf0] }
  0x12   :  { %262 = vmatpush.bf16.msra.mxu0 %v1117_v3  ;;  %v971_v47 = vor.u32 %v1134_v45, %v970_v44  ;;  %v1127_v49 = vld [vmem:[%s1478_s0 + $0x70] sm:$0xff]  ;;  %v975_v50 = vor.u32 %v1133_v46, %v972_v48  ;;  %v1132_v52 = vld [vmem:[#allocation2 + $0x14] sm:$0xf0]  ;;  %v964_v55 = vld [vmem:[#allocation2 + $0x18] sm:$0xf0] }
  0x13   :  { %v962_v51 = vld [vmem:[#allocation2 + $0x10] sm:$0xf]  ;;  %v1131_v53 = vld [vmem:[#allocation2 + $0x14] sm:$0xf]  ;;  %v954_v57 = vld [vmem:[#allocation2] sm:$0xf] }
  0x14   :  { %v963_v54 = vor.u32 %v1132_v52, %v962_v51  ;;  %v967_v56 = vor.u32 %v1131_v53, %v964_v55  ;;  %v1130_v58 = vld [vmem:[#allocation2 + $0x4] sm:$0xf0]  ;;  %v1129_v59 = vld [vmem:[#allocation2 + $0x4] sm:$0xf]  ;;  %v956_v61 = vld [vmem:[#allocation2 + $0x8] sm:$0xf0] }
  0x15   :  { %398 = vmatpush.bf16.msra.mxu1 %v995_v29  ;;  %447 = vmatpush.bf16.msra.mxu2 %v999_v31  ;;  %v955_v60 = vor.u32 %v1130_v58, %v954_v57  ;;  %v959_v62 = vor.u32 %v1129_v59, %v956_v61  ;;  %v1128_v63 = vld [vmem:[%s1478_s0 + $0x78] sm:$0xff] }
  0x16   :  { %263 = vmatpush.bf16.msra.mxu0 %v1116_v4 }
  0x19   :  { %399 = vmatpush.bf16.msra.mxu1 %v987_v35  ;;  %448 = vmatpush.bf16.msra.mxu2 %v991_v37 }
  0x1a   :  { %264 = vmatpush.bf16.msra.mxu0 %v1115_v5 }
  0x1d   :  { %400 = vmatpush.bf16.msra.mxu1 %v979_v42  ;;  %449 = vmatpush.bf16.msra.mxu2 %v983_v43 }
  0x1e   :  { %265 = vmatpush.bf16.msra.mxu0 %v1114_v6 }
  0x21   :  { %401 = vmatpush.bf16.msra.mxu1 %v971_v47  ;;  %450 = vmatpush.bf16.msra.mxu2 %v975_v50 }
  0x22   :  { %266 = vmatpush.bf16.msra.mxu0 %v1113_v7 }
  0x25   :  { %267 = vmatmul.bf16.vlgmr.msra.gmra.mxu0 %v1121_v8  ;;  %402 = vmatpush.bf16.msra.mxu1 %v963_v54 }
  0x26   :  { %451 = vmatpush.bf16.msra.mxu2 %v967_v56 }
  0x29   :  { %403 = vmatpush.bf16.msra.mxu1 %v955_v60 }
  0x2a   :  { %452 = vmatpush.bf16.msra.mxu2 %v959_v62 }
  0x35   :  { %272 = vmatmul.bf16.gmra.mxu0 %v1122_v9 }
  0x45   :  { %277 = vmatmul.bf16.gmra.mxu0 %v1123_v10 }
  0x55   :  { %282 = vmatmul.bf16.gmra.mxu0 %v1124_v11 }
  0x65   :  { %287 = vmatmul.bf16.gmra.mxu0 %v1125_v12 }
  0x75   :  { %292 = vmatmul.bf16.gmra.mxu0 %v1126_v25 }
  0x85   :  { %297 = vmatmul.bf16.gmra.mxu0 %v1127_v49 }
  0x95   :  { %302 = vmatmul.bf16.gmra.mxu0 %v1128_v63 }
  0xa2   :  { %v268_v0 = vpop.f32.mrf.mxu0 }
  0xaa   :  { %v270_v1 = vpop.f32.mrf.mxu0 }
  0xab   :  { %v308_v2 = vpack.c.bf16 %v270_v1, %v268_v0 }
  0xad   :  { %404 = vmatmul.bf16.vlgmr.msra.gmra.mxu1 %v308_v2  ;;  %453 = vmatmul.bf16.vlgmr.msra.gmra.mxu2 %v308_v2 }
  0xb2   :  { %v273_v3 = vpop.f32.mrf.mxu0 }
  0xba   :  { %v275_v4 = vpop.f32.mrf.mxu0 }
  0xbb   :  { %v309_v5 = vpack.c.bf16 %v275_v4, %v273_v3 }
  0xbd   :  { %409 = vmatmul.bf16.gmra.mxu1 %v309_v5  ;;  %458 = vmatmul.bf16.gmra.mxu2 %v309_v5 }
  0xc2   :  { %v278_v6 = vpop.f32.mrf.mxu0 }
  0xca   :  { %v280_v7 = vpop.f32.mrf.mxu0 }
  0xcb   :  { %v310_v8 = vpack.c.bf16 %v280_v7, %v278_v6 }
  0xcd   :  { %414 = vmatmul.bf16.gmra.mxu1 %v310_v8  ;;  %463 = vmatmul.bf16.gmra.mxu2 %v310_v8 }
  0xd2   :  { %v283_v9 = vpop.f32.mrf.mxu0 }
  0xda   :  { %v285_v10 = vpop.f32.mrf.mxu0 }
  0xdb   :  { %v311_v11 = vpack.c.bf16 %v285_v10, %v283_v9 }
  0xdd   :  { %419 = vmatmul.bf16.gmra.mxu1 %v311_v11  ;;  %468 = vmatmul.bf16.gmra.mxu2 %v311_v11 }
  0xe2   :  { %v288_v12 = vpop.f32.mrf.mxu0 }
  0xea   :  { %v290_v13 = vpop.f32.mrf.mxu0 }
  0xeb   :  { %v312_v14 = vpack.c.bf16 %v290_v13, %v288_v12 }
  0xed   :  { %424 = vmatmul.bf16.gmra.mxu1 %v312_v14  ;;  %473 = vmatmul.bf16.gmra.mxu2 %v312_v14 }
  0xf2   :  { %v293_v15 = vpop.f32.mrf.mxu0 }
  0xfa   :  { %v295_v16 = vpop.f32.mrf.mxu0 }
  0xfb   :  { %v313_v17 = vpack.c.bf16 %v295_v16, %v293_v15 }
  0xfd   :  { %429 = vmatmul.bf16.gmra.mxu1 %v313_v17  ;;  %478 = vmatmul.bf16.gmra.mxu2 %v313_v17 }
 0x102   :  { %v298_v18 = vpop.f32.mrf.mxu0 }
 0x10a   :  { %v300_v19 = vpop.f32.mrf.mxu0 }
 0x10b   :  { %v314_v20 = vpack.c.bf16 %v300_v19, %v298_v18 }
 0x10d   :  { %434 = vmatmul.bf16.gmra.mxu1 %v314_v20  ;;  %483 = vmatmul.bf16.gmra.mxu2 %v314_v20 }
 0x112   :  { %v303_v21 = vpop.f32.mrf.mxu0 }
 0x11a   :  { %v305_v22 = vpop.f32.mrf.mxu0 }
 0x11b   :  { %v315_v23 = vpack.c.bf16 %v305_v22, %v303_v21 }
 0x11d   :  { %439 = vmatmul.bf16.gmra.mxu1 %v315_v23  ;;  %488 = vmatmul.bf16.gmra.mxu2 %v315_v23 }
 0x12a   :  { %v405_v24 = vpop.f32.mrf.mxu1 }
 0x12b   :  { %v526_v26 = vmul.f32 0.2, %v405_v24  ;;  %vm494_vm0 = vcmp.gt.f32.partialorder %v405_v24, 0.0 }
 0x12d   :  { %v1279_v29 = vsel %vm494_vm0, %v405_v24, %v526_v26 }
 0x130   :  { %v454_v25 = vpop.f32.mrf.mxu2 }
 0x131   :  { %v527_v32 = vmul.f32 0.2, %v454_v25  ;;  %vm495_vm2 = vcmp.gt.f32.partialorder %v454_v25, 0.0 }
 0x132   :  { %v407_v27 = vpop.f32.mrf.mxu1 }
 0x133   :  { %vm496_vm1 = vcmp.gt.f32.partialorder %v407_v27, 0.0  ;;  %v528_v28 = vmul.f32 0.2, %v407_v27  ;;  %v1285_v36 = vsel %vm495_vm2, %v454_v25, %v527_v32 }
 0x135   :  { %v1281_v30 = vsel %vm496_vm1, %v407_v27, %v528_v28 }
 0x136   :  { %v590_v31 = vpack.c.bf16 %v1281_v30, %v1279_v29 }
 0x138   :  { %v456_v33 = vpop.f32.mrf.mxu2 }
 0x139   :  { %vm497_vm3 = vcmp.gt.f32.partialorder %v456_v33, 0.0  ;;  %v529_v34 = vmul.f32 0.2, %v456_v33 }
 0x13a   :  { %v410_v35 = vpop.f32.mrf.mxu1 }
 0x13b   :  { %v1287_v37 = vsel %vm497_vm3, %v456_v33, %v529_v34  ;;  %v530_v40 = vmul.f32 0.2, %v410_v35  ;;  %vm498_vm4 = vcmp.gt.f32.partialorder %v410_v35, 0.0 }
 0x13c   :  { %v591_v38 = vpack.c.bf16 %v1287_v37, %v1285_v36  ;;  %v1026_v37 = vld [vmem:[#allocation2 + $0x1a0] sm:$0xf] }
 0x13d   :  { %v1291_v43 = vsel %vm498_vm4, %v410_v35, %v530_v40 }
 0x140   :  { %v459_v39 = vpop.f32.mrf.mxu2 }
 0x141   :  { %v531_v46 = vmul.f32 0.2, %v459_v39  ;;  %vm499_vm6 = vcmp.gt.f32.partialorder %v459_v39, 0.0 }
 0x142   :  { %v412_v41 = vpop.f32.mrf.mxu1 }
 0x143   :  { %vm500_vm5 = vcmp.gt.f32.partialorder %v412_v41, 0.0  ;;  %v532_v42 = vmul.f32 0.2, %v412_v41  ;;  %v1297_v50 = vsel %vm499_vm6, %v459_v39, %v531_v46 }
 0x145   :  { %v1293_v44 = vsel %vm500_vm5, %v412_v41, %v532_v42 }
 0x146   :  { %v592_v45 = vpack.c.bf16 %v1293_v44, %v1291_v43  ;;  %v1106_v43 = vld [vmem:[#allocation2 + $0x160] sm:$0xf] }
 0x148   :  { %v461_v47 = vpop.f32.mrf.mxu2 }
 0x149   :  { %vm501_vm7 = vcmp.gt.f32.partialorder %v461_v47, 0.0  ;;  %v533_v48 = vmul.f32 0.2, %v461_v47 }
 0x14a   :  { %v415_v49 = vpop.f32.mrf.mxu1 }
 0x14b   :  { %v1299_v51 = vsel %vm501_vm7, %v461_v47, %v533_v48  ;;  %v534_v54 = vmul.f32 0.2, %v415_v49  ;;  %vm502_vm8 = vcmp.gt.f32.partialorder %v415_v49, 0.0 }
 0x14c   :  { %v593_v52 = vpack.c.bf16 %v1299_v51, %v1297_v50  ;;  %v1034_v50 = vld [vmem:[#allocation2 + $0x1c0] sm:$0xf]  ;;  %v1165_v51 = vld [vmem:[#allocation2 + $0x1c4] sm:$0xf0] }
 0x14d   :  { %v1303_v57 = vsel %vm502_vm8, %v415_v49, %v534_v54 }
 0x150   :  { %v464_v53 = vpop.f32.mrf.mxu2 }
 0x151   :  { %v535_v60 = vmul.f32 0.2, %v464_v53  ;;  %vm503_vm10 = vcmp.gt.f32.partialorder %v464_v53, 0.0 }
 0x152   :  { %v417_v55 = vpop.f32.mrf.mxu1 }
 0x153   :  { %vm504_vm9 = vcmp.gt.f32.partialorder %v417_v55, 0.0  ;;  %v536_v56 = vmul.f32 0.2, %v417_v55  ;;  %v1309_v0 = vsel %vm503_vm10, %v464_v53, %v535_v60 }
 0x155   :  { %v1305_v58 = vsel %vm504_vm9, %v417_v55, %v536_v56 }
 0x156   :  { %v594_v59 = vpack.c.bf16 %v1305_v58, %v1303_v57  ;;  %v127_v57 = vld [vmem:[#allocation2 + $0x200] sm:$0xf] }
 0x158   :  { %v466_v61 = vpop.f32.mrf.mxu2 }
 0x159   :  { %vm505_vm11 = vcmp.gt.f32.partialorder %v466_v61, 0.0  ;;  %v537_v62 = vmul.f32 0.2, %v466_v61 }
 0x15a   :  { %v420_v63 = vpop.f32.mrf.mxu1 }
 0x15b   :  { %v1311_v1 = vsel %vm505_vm11, %v466_v61, %v537_v62  ;;  %v538_v4 = vmul.f32 0.2, %v420_v63  ;;  %vm506_vm12 = vcmp.gt.f32.partialorder %v420_v63, 0.0 }
 0x15c   :  { %v595_v2 = vpack.c.bf16 %v1311_v1, %v1309_v0  ;;  %v1090_v0 = vld [vmem:[#allocation2 + $0x120] sm:$0xf]  ;;  %v1155_v1 = vld [vmem:[#allocation2 + $0x124] sm:$0xf0] }
 0x15d   :  { %v570_v7 = vsel %vm506_vm12, %v420_v63, %v538_v4 }
 0x160   :  { %v469_v3 = vpop.f32.mrf.mxu2 }
 0x161   :  { %v539_v10 = vmul.f32 0.2, %v469_v3  ;;  %vm507_vm14 = vcmp.gt.f32.partialorder %v469_v3, 0.0 }
 0x162   :  { %v422_v5 = vpop.f32.mrf.mxu1 }
 0x163   :  { %vm508_vm13 = vcmp.gt.f32.partialorder %v422_v5, 0.0  ;;  %v540_v6 = vmul.f32 0.2, %v422_v5  ;;  %v1315_v14 = vsel %vm507_vm14, %v469_v3, %v539_v10 }
 0x165   :  { %v572_v8 = vsel %vm508_vm13, %v422_v5, %v540_v6 }
 0x166   :  { %v596_v9 = vpack.c.bf16 %v572_v8, %v570_v7 }
 0x168   :  { %v471_v11 = vpop.f32.mrf.mxu2 }
 0x169   :  { %vm509_vm15 = vcmp.gt.f32.partialorder %v471_v11, 0.0  ;;  %v541_v12 = vmul.f32 0.2, %v471_v11 }
 0x16a   :  { %v425_v13 = vpop.f32.mrf.mxu1 }
 0x16b   :  { %v1317_v15 = vsel %vm509_vm15, %v471_v11, %v541_v12  ;;  %v542_v56 = vmul.f32 0.2, %v425_v13  ;;  %vm510_vm7 = vcmp.gt.f32.partialorder %v425_v13, 0.0 }
 0x16c   :  { %v597_v16 = vpack.c.bf16 %v1317_v15, %v1315_v14  ;;  %v1038_v15 = vld [vmem:[#allocation2 + $0x1d0] sm:$0xf] }
 0x16d   :  { %v574_v3 = vsel %vm510_vm7, %v425_v13, %v542_v56 }
 0x170   :  { %v1321_v18 = vpop.f32.mrf.mxu2 }
 0x171   :  { %vm511_vm15 = vcmp.gt.f32.partialorder %v1321_v18, 0.0 }
 0x172   :  { %v427_v17 = vpop.f32.mrf.mxu1 }
 0x173   :  { %v544_v54 = vmul.f32 0.2, %v427_v17  ;;  %vm512_vm6 = vcmp.gt.f32.partialorder %v427_v17, 0.0 }
 0x175   :  { %v576_v63 = vsel %vm512_vm6, %v427_v17, %v544_v54  ;;  %v1160_v17 = vld [vmem:[#allocation2 + $0x174] sm:$0xf0]  ;;  %v1030_v54 = vld [vmem:[#allocation2 + $0x1b0] sm:$0xf] }
 0x176   :  { %v598_v4 = vpack.c.bf16 %v576_v63, %v574_v3  ;;  %v1154_v63 = vld [vmem:[#allocation2 + $0x114] sm:$0xf0] }
 0x178   :  { %v1323_v20 = vpop.f32.mrf.mxu2 }
 0x179   :  { %v545_v30 = vmul.f32 0.2, %v1323_v20  ;;  %vm513_vm14 = vcmp.gt.f32.partialorder %v1323_v20, 0.0 }
 0x17a   :  { %v430_v19 = vpop.f32.mrf.mxu1 }
 0x17b   :  { %v546_v48 = vmul.f32 0.2, %v430_v19  ;;  %vm514_vm5 = vcmp.gt.f32.partialorder %v430_v19, 0.0 }
 0x17d   :  { %v578_v60 = vsel %vm514_vm5, %v430_v19, %v546_v48  ;;  %v1042_v48 = vld [vmem:[#allocation2 + $0x1e0] sm:$0xf] }
 0x180   :  { %v1325_v22 = vpop.f32.mrf.mxu2 }
 0x181   :  { %v547_v19 = vmul.f32 0.2, %v1325_v22  ;;  %vm515_vm13 = vcmp.gt.f32.partialorder %v1325_v22, 0.0 }
 0x182   :  { %v432_v21 = vpop.f32.mrf.mxu1 }
 0x183   :  { %v548_v46 = vmul.f32 0.2, %v432_v21  ;;  %vm516_vm4 = vcmp.gt.f32.partialorder %v432_v21, 0.0 }
 0x185   :  { %v580_v55 = vsel %vm516_vm4, %v432_v21, %v548_v46 }
 0x186   :  { %v600_v61 = vpack.c.bf16 %v580_v55, %v578_v60  ;;  %v1164_v55 = vld [vmem:[#allocation2 + $0x1b4] sm:$0xf0]  ;;  %v1022_v60 = vld [vmem:[#allocation2 + $0x190] sm:$0xf] }
 0x187   :  { %v1031_v36 = vor.u32 %v1164_v55, %v1030_v54  ;;  %v130_v54 = vld [vmem:[%s1480_s2 + $0x10] sm:$0xff]  ;;  %v129_v55 = vld [vmem:[%s1480_s2 + $0x8] sm:$0xff] }
 0x188   :  { %v1327_v24 = vpop.f32.mrf.mxu2 }
 0x189   :  { %vm517_vm12 = vcmp.gt.f32.partialorder %v1327_v24, 0.0 }
 0x18a   :  { %v435_v23 = vpop.f32.mrf.mxu1 }
 0x18b   :  { %v550_v35 = vmul.f32 0.2, %v435_v23  ;;  %vm518_vm3 = vcmp.gt.f32.partialorder %v435_v23, 0.0 }
 0x18d   :  { %v582_v49 = vsel %vm518_vm3, %v435_v23, %v550_v35  ;;  %v1098_v35 = vld [vmem:[#allocation2 + $0x140] sm:$0xf] }
 0x190   :  { %v1329_v27 = vpop.f32.mrf.mxu2 }
 0x191   :  { %v551_v11 = vmul.f32 0.2, %v1329_v27  ;;  %vm519_vm11 = vcmp.gt.f32.partialorder %v1329_v27, 0.0 }
 0x192   :  { %v437_v25 = vpop.f32.mrf.mxu1 }
 0x193   :  { %v552_v33 = vmul.f32 0.2, %v437_v25  ;;  %vm520_vm2 = vcmp.gt.f32.partialorder %v437_v25, 0.0  ;;  %v583_v21 = vsel %vm519_vm11, %v1329_v27, %v551_v11 }
 0x195   :  { %v584_v47 = vsel %vm520_vm2, %v437_v25, %v552_v33  ;;  %v1102_v25 = vld [vmem:[#allocation2 + $0x150] sm:$0xf] }
 0x196   :  { %v602_v53 = vpack.c.bf16 %v584_v47, %v582_v49  ;;  %v1168_v47 = vld [vmem:[#allocation2 + $0x1f4] sm:$0xf0]  ;;  %v1167_v49 = vld [vmem:[#allocation2 + $0x1e4] sm:$0xf0] }
 0x197   :  { %v1043_v14 = vor.u32 %v1167_v49, %v1042_v48  ;;  %v137_v48 = vld [vmem:[%s1480_s2 + $0x48] sm:$0xff]  ;;  %v136_v49 = vld [vmem:[%s1480_s2 + $0x40] sm:$0xff] }
 0x198   :  { %v486_v39 = vpop.f32.mrf.mxu2 }
 0x199   :  { %v553_v8 = vmul.f32 0.2, %v486_v39  ;;  %vm521_vm10 = vcmp.gt.f32.partialorder %v486_v39, 0.0 }
 0x19a   :  { %v440_v26 = vpop.f32.mrf.mxu1 }
 0x19b   :  { %v554_v28 = vmul.f32 0.2, %v440_v26  ;;  %vm522_vm0 = vcmp.gt.f32.partialorder %v440_v26, 0.0  ;;  %v585_v58 = vsel %vm521_vm10, %v486_v39, %v553_v8  ;;  %v1157_v39 = vld [vmem:[#allocation2 + $0x144] sm:$0xf0] }
 0x19c   :  { %v603_v23 = vpack.c.bf16 %v585_v58, %v583_v21  ;;  %v1152_v8 = vld [vmem:[#allocation2 + $0xf4] sm:$0xf0]  ;;  %v1070_v58 = vld [vmem:[#allocation2 + $0xd0] sm:$0xf] }
 0x19d   :  { %v586_v40 = vsel %vm522_vm0, %v440_v26, %v554_v28  ;;  %v1158_v26 = vld [vmem:[#allocation2 + $0x154] sm:$0xf0]  ;;  %v543_v28 = vmul.f32 0.2, %v1321_v18 }
 0x19e   :  { %v1103_v33 = vor.u32 %v1158_v26, %v1102_v25  ;;  %v1148_v21 = vld [vmem:[#allocation2 + $0xb4] sm:$0xf0]  ;;  %v1054_v25 = vld [vmem:[#allocation2 + $0x90] sm:$0xf] }
 0x19f   :  { %v1146_v26 = vld [vmem:[#allocation2 + $0x94] sm:$0xf0] }
 0x1a0   :  { %v489_v62 = vpop.f32.mrf.mxu2 }
 0x1a1   :  { %v555_v7 = vmul.f32 0.2, %v489_v62  ;;  %vm523_vm9 = vcmp.gt.f32.partialorder %v489_v62, 0.0 }
 0x1a2   :  { %v442_v32 = vpop.f32.mrf.mxu1 }
 0x1a3   :  { %v556_v34 = vmul.f32 0.2, %v442_v32  ;;  %vm524_vm1 = vcmp.gt.f32.partialorder %v442_v32, 0.0  ;;  %v587_v12 = vsel %vm523_vm9, %v489_v62, %v555_v7  ;;  %v1086_v62 = vld [vmem:[#allocation2 + $0x110] sm:$0xf] }
 0x1a4   :  { %v1087_v3 = vor.u32 %v1154_v63, %v1086_v62  ;;  %v1078_v7 = vld [vmem:[#allocation2 + $0xf0] sm:$0xf]  ;;  %v155_v62 = vld [vmem:[%s1480_s2 + $0xd8] sm:$0xff] }
 0x1a5   :  { %v588_v41 = vsel %vm524_vm1, %v442_v32, %v556_v34  ;;  %v579_v32 = vsel %vm515_vm13, %v1325_v22, %v547_v19  ;;  %v577_v34 = vsel %vm513_vm14, %v1323_v20, %v545_v30  ;;  %v1094_v22 = vld [vmem:[#allocation2 + $0x130] sm:$0xf]  ;;  %v1079_v11 = vor.u32 %v1152_v8, %v1078_v7  ;;  %v1147_v30 = vld [vmem:[#allocation2 + $0xa4] sm:$0xf0] }
 0x1a6   :  { %v604_v42 = vpack.c.bf16 %v588_v41, %v586_v40  ;;  %v1099_v41 = vor.u32 %v1157_v39, %v1098_v35  ;;  %v1046_v20 = vld [vmem:[#allocation2 + $0x1f0] sm:$0xf]  ;;  %v1153_v35 = vld [vmem:[#allocation2 + $0x104] sm:$0xf0] }
 0x1a7   :  { %v1062_v19 = vld [vmem:[#allocation2 + $0xb0] sm:$0xf]  ;;  %v149_v8 = vld [vmem:[%s1480_s2 + $0xa8] sm:$0xff] }
 0x1a8   :  { %606 = vmatpush.bf16.msra.mxu3 %v604_v42  ;;  %v491_v5 = vpop.f32.mrf.mxu2  ;;  %v1156_v42 = vld [vmem:[#allocation2 + $0x134] sm:$0xf0]  ;;  %v154_v63 = vld [vmem:[%s1480_s2 + $0xd0] sm:$0xff] }
 0x1a9   :  { %v557_v6 = vmul.f32 0.2, %v491_v5  ;;  %vm525_vm8 = vcmp.gt.f32.partialorder %v491_v5, 0.0  ;;  %v1095_v46 = vor.u32 %v1156_v42, %v1094_v22  ;;  %v142_v22 = vld [vmem:[%s1480_s2 + $0x70] sm:$0xff]  ;;  %v141_v42 = vld [vmem:[%s1480_s2 + $0x68] sm:$0xff] }
 0x1aa   :  { %v150_v7 = vld [vmem:[%s1480_s2 + $0xb0] sm:$0xff] }
 0x1ab   :  { %v589_v10 = vsel %vm525_vm8, %v491_v5, %v557_v6  ;;  %v1018_v5 = vld [vmem:[#allocation2 + $0x180] sm:$0xf]  ;;  %v1161_v6 = vld [vmem:[#allocation2 + $0x184] sm:$0xf0] }
 0x1ac   :  { %607 = vmatpush.bf16.msra.mxu3 %v602_v53  ;;  %v605_v13 = vpack.c.bf16 %v589_v10, %v587_v12  ;;  %v1019_v10 = vor.u32 %v1161_v6, %v1018_v5  ;;  %v1074_v12 = vld [vmem:[#allocation2 + $0xe0] sm:$0xf]  ;;  %v151_v6 = vld [vmem:[%s1480_s2 + $0xb8] sm:$0xff] }
 0x1ad   :  { %v152_v5 = vld [vmem:[%s1480_s2 + $0xc0] sm:$0xff] }
 0x1b0   :  { %608 = vmatpush.bf16.msra.mxu3 %v600_v61  ;;  %v1162_v61 = vld [vmem:[#allocation2 + $0x194] sm:$0xf0] }
 0x1b4   :  { %609 = vmatpush.bf16.msra.mxu3 %v598_v4  ;;  %v1023_v4 = vor.u32 %v1162_v61, %v1022_v60  ;;  %v157_v60 = vld [vmem:[%s1480_s2 + $0xe8] sm:$0xff]  ;;  %v156_v61 = vld [vmem:[%s1480_s2 + $0xe0] sm:$0xff] }
 0x1b8   :  { %610 = vmatpush.bf16.msra.mxu3 %v596_v9  ;;  %v549_v9 = vmul.f32 0.2, %v1327_v24 }
 0x1bc   :  { %611 = vmatpush.bf16.msra.mxu3 %v594_v59  ;;  %v1110_v59 = vld [vmem:[#allocation2 + $0x170] sm:$0xf] }
 0x1bd   :  { %v1111_v44 = vor.u32 %v1160_v17, %v1110_v59  ;;  %v1150_v59 = vld [vmem:[#allocation2 + $0xd4] sm:$0xf0] }
 0x1be   :  { %v1071_v17 = vor.u32 %v1150_v59, %v1070_v58  ;;  %v145_v59 = vld [vmem:[%s1480_s2 + $0x88] sm:$0xff] }
 0x1bf   :  { %804 = vmatpush.bf16.msrb.mxu0 %v1111_v44  ;;  %v1149_v44 = vld [vmem:[#allocation2 + $0xc4] sm:$0xf0] }
 0x1c0   :  { %612 = vmatpush.bf16.msra.mxu3 %v592_v45  ;;  %v1159_v45 = vld [vmem:[#allocation2 + $0x164] sm:$0xf0] }
 0x1c1   :  { %v1107_v29 = vor.u32 %v1159_v45, %v1106_v43  ;;  %v1066_v43 = vld [vmem:[#allocation2 + $0xc0] sm:$0xf] }
 0x1c2   :  { %v1067_v45 = vor.u32 %v1149_v44, %v1066_v43  ;;  %v144_v43 = vld [vmem:[%s1480_s2 + $0x80] sm:$0xff] }
 0x1c3   :  { %805 = vmatpush.bf16.msrb.mxu0 %v1107_v29  ;;  %v1058_v29 = vld [vmem:[#allocation2 + $0xa0] sm:$0xf] }
 0x1c4   :  { %613 = vmatpush.bf16.msra.mxu3 %v590_v31  ;;  %v581_v31 = vsel %vm517_vm12, %v1327_v24, %v549_v9  ;;  %v575_v24 = vsel %vm511_vm15, %v1321_v18, %v543_v28  ;;  %v1047_v18 = vor.u32 %v1168_v47, %v1046_v20  ;;  %v1151_v9 = vld [vmem:[#allocation2 + $0xe4] sm:$0xf0]  ;;  %v1055_v28 = vor.u32 %v1146_v26, %v1054_v25  ;;  %v139_v47 = vld [vmem:[%s1480_s2 + $0x58] sm:$0xff] }
 0x1c5   :  { %v601_v27 = vpack.c.bf16 %v581_v31, %v579_v32  ;;  %v599_v40 = vpack.c.bf16 %v577_v34, %v575_v24  ;;  %v1059_v31 = vor.u32 %v1147_v30, %v1058_v29  ;;  %v1050_v32 = vld [vmem:[#allocation2 + $0x80] sm:$0xf] }
 0x1c6   :  { %v1082_v34 = vld [vmem:[#allocation2 + $0x100] sm:$0xf] }
 0x1c7   :  { %614 = vmatmul.bf16.vlgmr.msra.gmra.mxu3 %v127_v57  ;;  %806 = vmatpush.bf16.msrb.mxu0 %v1103_v33  ;;  %v1083_v39 = vor.u32 %v1153_v35, %v1082_v34  ;;  %v1174_v30 = vld [vmem:[%s1480_s2 + $0x102] ss:$0 sm:$0xff] }
 0x1c8   :  { %619 = vmatpush.bf16.msrb.mxu3 %v605_v13  ;;  %v62_v13 = vld [vmem:[%s1478_s0 + $0x80] sm:$0xf] }
 0x1cb   :  { %807 = vmatpush.bf16.msrb.mxu0 %v1099_v41 }
 0x1cc   :  { %620 = vmatpush.bf16.msrb.mxu3 %v603_v23  ;;  %v1063_v23 = vor.u32 %v1148_v21, %v1062_v19  ;;  %v1173_v19 = vld [vmem:[%s1480_s2 + $0x101] ss:$0 sm:$0xff] }
 0x1cf   :  { %808 = vmatpush.bf16.msrb.mxu0 %v1095_v46  ;;  %v140_v46 = vld [vmem:[%s1480_s2 + $0x60] sm:$0xff] }
 0x1d0   :  { %621 = vmatpush.bf16.msrb.mxu3 %v601_v27  ;;  %v1145_v27 = vld [vmem:[#allocation2 + $0x84] sm:$0xf0] }
 0x1d1   :  { %v1051_v33 = vor.u32 %v1145_v27, %v1050_v32 }
 0x1d4   :  { %622 = vmatpush.bf16.msrb.mxu3 %v599_v40  ;;  %v143_v40 = vld [vmem:[%s1480_s2 + $0x78] sm:$0xff] }
 0x1d5   :  { %821 = vmatpush.msrb.mxu1 %v143_v40 }
 0x1d7   :  { %822 = vmatpush.msrb.mxu1 %v142_v22 }
 0x1d8   :  { %623 = vmatpush.bf16.msrb.mxu3 %v597_v16  ;;  %v1166_v16 = vld [vmem:[#allocation2 + $0x1d4] sm:$0xf0] }
 0x1d9   :  { %v1039_v53 = vor.u32 %v1166_v16, %v1038_v15  ;;  %823 = vmatpush.msrb.mxu1 %v141_v42  ;;  %v134_v15 = vld [vmem:[%s1480_s2 + $0x30] sm:$0xff]  ;;  %v133_v16 = vld [vmem:[%s1480_s2 + $0x28] sm:$0xff] }
 0x1db   :  { %824 = vmatpush.msrb.mxu1 %v140_v46 }
 0x1dc   :  { %624 = vmatpush.bf16.msrb.mxu3 %v595_v2  ;;  %v1091_v2 = vor.u32 %v1155_v1, %v1090_v0  ;;  %v132_v0 = vld [vmem:[%s1480_s2 + $0x20] sm:$0xff] }
 0x1dd   :  { %825 = vmatpush.msrb.mxu1 %v139_v47 }
 0x1de   :  { %809 = vmatpush.bf16.msrb.mxu0 %v1091_v2 }
 0x1e0   :  { %625 = vmatpush.bf16.msrb.mxu3 %v593_v52  ;;  %v1035_v52 = vor.u32 %v1165_v51, %v1034_v50 }
 0x1e2   :  { %810 = vmatpush.bf16.msrb.mxu0 %v1087_v3 }
 0x1e4   :  { %626 = vmatpush.bf16.msrb.mxu3 %v591_v38  ;;  %v1163_v38 = vld [vmem:[#allocation2 + $0x1a4] sm:$0xf0] }
 0x1e5   :  { %v1027_v56 = vor.u32 %v1163_v38, %v1026_v37  ;;  %v159_v37 = vld [vmem:[%s1480_s2 + $0xf8] sm:$0xff]  ;;  %v158_v38 = vld [vmem:[%s1480_s2 + $0xf0] sm:$0xff] }
 0x1e6   :  { %811 = vmatpush.bf16.msrb.mxu0 %v1083_v39  ;;  %843 = vmatpush.msrb.mxu2 %v159_v37 }
 0x1e7   :  { %627 = vmatmul.bf16.vlgmr.msrb.gmra.mxu3 %v127_v57  ;;  %v1075_v57 = vor.u32 %v1151_v9, %v1074_v12  ;;  %v1172_v9 = vld [vmem:[%s1480_s2 + $0x100] ss:$0 sm:$0xff] }
 0x1e8   :  { %682 = vmatpush.bf16.msra.mxu3 %v1047_v18  ;;  %v138_v18 = vld [vmem:[%s1480_s2 + $0x50] sm:$0xff]  ;;  %844 = vmatpush.msrb.mxu2 %v158_v38 }
 0x1e9   :  { %826 = vmatpush.msrb.mxu1 %v138_v18 }
 0x1ea   :  { %845 = vmatpush.msrb.mxu2 %v157_v60 }
 0x1eb   :  { %827 = vmatpush.msrb.mxu1 %v137_v48 }
 0x1ec   :  { %683 = vmatpush.bf16.msra.mxu3 %v1043_v14  ;;  %v135_v14 = vld [vmem:[%s1480_s2 + $0x38] sm:$0xff]  ;;  %846 = vmatpush.msrb.mxu2 %v156_v61 }
 0x1ed   :  { %828 = vmatpush.msrb.mxu1 %v136_v49 }
 0x1ee   :  { %847 = vmatpush.msrb.mxu2 %v155_v62 }
 0x1ef   :  { %829 = vmatpush.msrb.mxu1 %v135_v14 }
 0x1f0   :  { %684 = vmatpush.bf16.msra.mxu3 %v1039_v53  ;;  %v131_v53 = vld [vmem:[%s1480_s2 + $0x18] sm:$0xff]  ;;  %848 = vmatpush.msrb.mxu2 %v154_v63 }
 0x1f1   :  { %830 = vmatpush.msrb.mxu1 %v134_v15 }
 0x1f3   :  { %831 = vmatpush.msrb.mxu1 %v133_v16 }
 0x1f4   :  { %685 = vmatpush.bf16.msra.mxu3 %v1035_v52 }
 0x1f5   :  { %832 = vmatpush.msrb.mxu1 %v132_v0 }
 0x1f7   :  { %833 = vmatpush.msrb.mxu1 %v131_v53 }
 0x1f8   :  { %686 = vmatpush.bf16.msra.mxu3 %v1031_v36  ;;  %v128_v36 = vld [vmem:[%s1480_s2] sm:$0xff] }
 0x1f9   :  { %834 = vmatpush.msrb.mxu1 %v130_v54 }
 0x1fb   :  { %835 = vmatpush.msrb.mxu1 %v129_v55 }
 0x1fc   :  { %687 = vmatpush.bf16.msra.mxu3 %v1027_v56 }
 0x1fd   :  { %836 = vmatpush.msrb.mxu1 %v128_v36 }
 0x200   :  { %688 = vmatpush.bf16.msra.mxu3 %v1023_v4  ;;  %v153_v4 = vld [vmem:[%s1480_s2 + $0xc8] sm:$0xff] }
 0x201   :  { %849 = vmatpush.msrb.mxu2 %v153_v4 }
 0x203   :  { %850 = vmatpush.msrb.mxu2 %v152_v5 }
 0x204   :  { %689 = vmatpush.bf16.msra.mxu3 %v1019_v10  ;;  %v148_v10 = vld [vmem:[%s1480_s2 + $0xa0] sm:$0xff] }
 0x205   :  { %851 = vmatpush.msrb.mxu2 %v151_v6 }
 0x207   :  { %690 = vmatmul.bf16.vlgmr.msra.gmra.mxu3 %v62_v13  ;;  %852 = vmatpush.msrb.mxu2 %v150_v7 }
 0x208   :  { %791 = vmatpush.bf16.msrb.mxu3 %v1079_v11  ;;  %v147_v11 = vld [vmem:[%s1480_s2 + $0x98] sm:$0xff] }
 0x209   :  { %853 = vmatpush.msrb.mxu2 %v149_v8 }
 0x20b   :  { %854 = vmatpush.msrb.mxu2 %v148_v10 }
 0x20c   :  { %792 = vmatpush.bf16.msrb.mxu3 %v1075_v57  ;;  %v146_v57 = vld [vmem:[%s1480_s2 + $0x90] sm:$0xff] }
 0x20d   :  { %855 = vmatpush.msrb.mxu2 %v147_v11 }
 0x20f   :  { %856 = vmatpush.msrb.mxu2 %v146_v57 }
 0x210   :  { %793 = vmatpush.bf16.msrb.mxu3 %v1071_v17 }
 0x211   :  { %857 = vmatpush.msrb.mxu2 %v145_v59 }
 0x213   :  { %858 = vmatpush.msrb.mxu2 %v144_v43 }
 0x214   :  { %794 = vmatpush.bf16.msrb.mxu3 %v1067_v45 }
 0x218   :  { %795 = vmatpush.bf16.msrb.mxu3 %v1063_v23 }
 0x21c   :  { %796 = vmatpush.bf16.msrb.mxu3 %v1059_v31 }
 0x220   :  { %797 = vmatpush.bf16.msrb.mxu3 %v1055_v28 }
 0x224   :  { %798 = vmatpush.bf16.msrb.mxu3 %v1051_v33 }
 0x24a   :  { %v615_v24 = vpop.f32.mrf.mxu3 }
 0x24b   :  { %v632_v41 = vpack.c.bf16 %v615_v24, %v615_v24 }
 0x24d   :  { %799 = vmatmul.bf16.vlgmr.msrb.gmra.mxu3 %v632_v41 }
 0x252   :  { %v617_v20 = vpop.f32.mrf.mxu3 }
 0x26a   :  { %v628_v1 = vpop.f32.mrf.mxu3 }
 0x26b   :  { %v633_v2 = vpack.c.bf16 %v628_v1, %v628_v1 }
 0x26d   :  { %812 = vmatmul.bf16.vlgmr.msrb.gmra.mxu0 %v633_v2 }
 0x272   :  { %v630_v50 = vpop.f32.mrf.mxu3 }
 0x28a   :  { %v691_v51 = vpop.f32.mrf.mxu3 }
 0x292   :  { %v693_v52 = vpop.f32.mrf.mxu3 }
 0x2d0   :  { %v800_v56 = vpop.f32.mrf.mxu3 }
 0x2d1   :  { %v801_v12 = vadd.f32 %v800_v56, %v691_v51 }
 0x2d8   :  { %v802_v3 = vpop.f32.mrf.mxu3 }
 0x2ea   :  { %v813_v13 = vpop.f32.mrf.mxu0 }
 0x2eb   :  { %v814_v58 = vadd.f32 %v813_v13, %v801_v12 }
 0x2ed   :  { %v818_v17 = vadd.f32 %v1172_v9, %v814_v58 }
 0x2ef   :  { %v819_v44 = vmax.f32 %v818_v17, 0.0 }
 0x2f1   :  { %837 = vmatmul.f32.vlgmr.msrb.gmra.mxu1 %v819_v44 }
 0x2f2   :  { %v815_v45 = vpop.f32.mrf.mxu0 }
 0x36e   :  { %v838_v21 = vpop.f32.mrf.mxu1 }
 0x36f   :  { %v839_v23 = vadd.f32 %v1173_v19, %v838_v21 }
 0x371   :  { %v841_v29 = vmax.f32 %v839_v23, 0.0 }
 0x373   :  { %859 = vmatmul.f32.vlgmr.msrb.gmra.mxu2 %v841_v29 }
 0x3f6   :  { %v860_v31 = vpop.f32.mrf.mxu2 }
 0x3f7   :  { %v861_v25 = vadd.f32 %v1174_v30, %v860_v31 }
 0x3f9   :  { %v1112_v26 = vmul.f32 -1.442695, %v861_v25 }
 0x3fb   :  { %1175 = vpow2.f32 %v1112_v26 }
 0x401   :  { %v1176_v28 = vpop.eup %1175 }
 0x402   :  { %v866_v32 = vadd.f32 1.0, %v1176_v28 }
 0x404   :  { %1177 = vrcp.f32 %v866_v32  ;;  %v878_v35 = vand.u32 2147483648, %v866_v32  ;;  %v876_v24 = vand.u32 2147483647, %v866_v32  ;;  %vm872_vm1 = vweird.f32 %v866_v32 }
 0x406   :  { %v879_v41 = vor.u32 1.1754944e-38, %v878_v35  ;;  %vm877_vm3 = vcmp.eq.f32.partialorder %v876_v24, 8.507059e+37 }
 0x40a   :  { %v1178_v27 = vpop.eup %1177 }
 0x40b   :  { %v868_v33 = vmul.f32 %v1178_v27, %v866_v32  ;;  %vm873_vm0 = vweird.f32 %v1178_v27 }
 0x40c   :  { %vm874_vm2 = vmor %vm872_vm1, %vm873_vm0 }
 0x40d   :  { %v869_v34 = vsub.f32 1.0, %v868_v33 }
 0x40f   :  { %v870_v39 = vmul.f32 %v1178_v27, %v869_v34 }
 0x411   :  { %v871_v40 = vadd.f32 %v1178_v27, %v870_v39 }
 0x413   :  { %v875_v22 = vsel %vm874_vm2, %v1178_v27, %v871_v40 }
 0x414   :  { %v880_v42 = vsel %vm877_vm3, %v879_v41, %v875_v22 }
 0x415   :  { %882 = vst [vmem:[%s1481_s3] sm:$0xff] %v880_v42 }
 0x416   :  { %887 = vsyncpa [#allocation3], 1 }

</bundles_post_ra>
